<compile_context>
chip_gen: v6e
topology: v6e:2x2x1
jax: 0.10.0
libtpu: 0.0.40
codegen_flags: <defaults>
</compile_context>

<pallas_src>
import numpy as np
import jax
import jax.numpy as jnp
from jax.experimental import pallas as pl
from jax.experimental.pallas import tpu as pltpu


def _bilinear_matrix(dst, src):
    """Row-stochastic (dst, src) matrix reproducing F.interpolate(
    mode='bilinear', align_corners=False) along one spatial axis."""
    scale = src / dst
    coord = (np.arange(dst, dtype=np.float64) + 0.5) * scale - 0.5
    coord = np.clip(coord, 0.0, src - 1)
    i0 = np.floor(coord).astype(np.int64)
    i1 = np.minimum(i0 + 1, src - 1)
    w1 = (coord - i0).astype(np.float32)
    w0 = (1.0 - w1).astype(np.float32)
    m = np.zeros((dst, src), np.float32)
    m[np.arange(dst), i0] += w0
    m[np.arange(dst), i1] += w1
    return m


def _pick_batch_tile(batch, per_elem_bytes, budget_bytes=12 << 20):
    """Largest batch tile that (a) divides B, (b) keeps >= 2 grid steps when
    B >= 2 (v7x has 2 TensorCores -> a length-1 'parallel' grid idles one TC),
    and (c) keeps the per-step working set inside a ~12 MiB VMEM budget so the
    double-buffered pipeline stays well under v7x's 64 MiB physical VMEM."""
    best = 1
    for bt in range(1, batch + 1):
        if batch % bt != 0:
            continue
        if bt * per_elem_bytes > budget_bytes:
            break
        if batch >= 2 and batch // bt < 2:
            break
        best = bt
    return best


def _head_kernel(feat_ref, w_ref, eh_ref, ew_ref, lh_ref, lwt_ref, bias_ref,
                 out_ref):
    """Bt images per grid step: conv1x1 -> separable bilinear -> sigmoid.

    feat_ref : (Bt, C, P)  bf16   NCHW-flattened backbone features, P = Hf*Wf
    w_ref    : (1, C)      bf16   classifier[4] 1x1-conv weight
    eh_ref   : (Hf, P)     bf16   row selector   eh[h, p] = [p // Wf == h]
    ew_ref   : (P, Wf)     bf16   col compactor  ew[p, w] = [p %  Wf == w]
    lh_ref   : (H, Hf)     bf16   bilinear height-upsample factor
    lwt_ref  : (Wf, W)     bf16   bilinear width-upsample factor (transposed)
    bias_ref : (1,)        f32    classifier[4] bias (SMEM scalar)
    out_ref  : (Bt, H, W)  f32/bf16  sigmoid probabilities
    """
    w = w_ref[...]
    eh = eh_ref[...]
    ew = ew_ref[...]
    lh = lh_ref[...]
    lwt = lwt_ref[...]
    bias = bias_ref[0]                      # scalar stays on the SMEM/sreg path

    bt = out_ref.shape[0]
    for t in range(bt):                     # static unroll; Bt is small (1..8)
        # 1x1 conv (C -> 1): lane-dense K=C MXU contraction, f32 accumulation.
        y = jnp.dot(w, feat_ref[t],
                    preferred_element_type=jnp.float32)        # (1, P)

        # Un-flatten (1, Hf*Wf) -> (Hf, Wf) without a scatter loop or relayout:
        # broadcast the flat row over Hf rows, keep each row's Wf-wide block via
        # the 0/1 selector (VPU), then compact columns with a 0/1 MXU matmul.
        d = eh * y.astype(jnp.bfloat16)                         # (Hf, P)
        y2d = jnp.dot(d, ew,
                      preferred_element_type=jnp.float32)       # (Hf, Wf)

        # Separable bilinear upsample, f32 accumulation on the MXU.
        t1 = jnp.dot(y2d.astype(jnp.bfloat16), lwt,
                     preferred_element_type=jnp.float32)        # (Hf, W)
        up = jnp.dot(lh, t1.astype(jnp.bfloat16),
                     preferred_element_type=jnp.float32)        # (H, W)

        # Bias in the f32 epilogue (bilinear rows sum to 1 -> equivalent, and
        # keeps the bias out of the bf16 matmul path).
        logits = up + bias

        # Sigmoid as a single EUP tanh; exactly bounded in [0, 1].
        out_ref[t] = (0.5 * jnp.tanh(0.5 * logits) + 0.5).astype(out_ref.dtype)


def base_module_forward(image_nchw, features_nchw, conv_w, conv_b,
                        out_dtype=jnp.float32):
    """image_nchw:    (B, 3, H, W)       -- only used for the output size
       features_nchw: (B, 256, Hf, Wf)   -- stand-in for classifier[0:4] output
       conv_w:        (1, 256, 1, 1)     -- classifier[4] weight
       conv_b:        (1,)               -- classifier[4] bias
       returns        (B, 1, H, W) out_dtype (default f32), matching the module
    """
    B, _, H, W = image_nchw.shape
    _, C, Hf, Wf = features_nchw.shape
    P = Hf * Wf

    # --- glue / parameter setup (plain JAX / numpy), no feature transpose ----
    feat = features_nchw.reshape(B, C, P).astype(jnp.bfloat16)
    w = conv_w.reshape(1, C).astype(jnp.bfloat16)
    bias = conv_b.reshape(1).astype(jnp.float32)

    lh = jnp.asarray(_bilinear_matrix(H, Hf), dtype=jnp.bfloat16)     # (H, Hf)
    lwt = jnp.asarray(_bilinear_matrix(W, Wf).T, dtype=jnp.bfloat16)  # (Wf, W)

    # Constant 0/1 "un-flatten" operators (exact in bf16); ~0.6 MiB total even
    # at realistic Hf=Wf=64, resident once in VMEM (constant index_map).
    p_rows = np.repeat(np.arange(Hf), Wf)
    p_cols = np.tile(np.arange(Wf), Hf)
    eh = jnp.asarray((np.arange(Hf)[:, None] == p_rows[None, :])
                     .astype(np.float32), dtype=jnp.bfloat16)         # (Hf, P)
    ew = jnp.asarray((p_cols[:, None] == np.arange(Wf)[None, :])
                     .astype(np.float32), dtype=jnp.bfloat16)         # (P, Wf)

    # --- batch blocking + explicit VMEM budget (v7x: 64 MiB physical) --------
    out_itemsize = jnp.dtype(out_dtype).itemsize
    per_elem = C * P * 2 + H * W * out_itemsize        # bf16 feat + out block
    bt = _pick_batch_tile(B, per_elem)                 # toy B=2 -> bt=1, grid=2
    nb = B // bt

    const_bytes = 2 * (C + Hf * P + P * Wf + H * Hf + Wf * W)
    vmem_limit = int(min(max(2 * bt * per_elem            # double-buffered blocks
                             + const_bytes
                             + bt * H * W * 4              # f32 up/sigmoid temps
                             + (8 << 20),                  # headroom
                             32 << 20),
                         64 << 20))

    flops = 2 * B * (C * P + Hf * P * Wf + Hf * Wf * W + H * Hf * W) \
        + 4 * B * H * W
    bytes_accessed = B * C * P * 2 + B * H * W * out_itemsize + const_bytes + 4

    # NOTE: output kept (Bt, H, W); at realistic W (512) the last dim is a
    # multiple of 128 -> unmasked lane-dense stores.  If a trace shows exposed
    # feature DMA after batch blocking, add pipeline_mode=pl.Buffered(3) to the
    # feature BlockSpec.
    out = pl.pallas_call(
        _head_kernel,
        out_shape=jax.ShapeDtypeStruct((B, H, W), out_dtype),
        grid=(nb,),
        in_specs=[
            pl.BlockSpec((bt, C, P), lambda b: (b, 0, 0)),   # features
            pl.BlockSpec((1, C), lambda b: (0, 0)),          # conv weight
            pl.BlockSpec((Hf, P), lambda b: (0, 0)),         # Eh (row selector)
            pl.BlockSpec((P, Wf), lambda b: (0, 0)),         # Ew (col compactor)
            pl.BlockSpec((H, Hf), lambda b: (0, 0)),         # Lh
            pl.BlockSpec((Wf, W), lambda b: (0, 0)),         # Lw^T
            pl.BlockSpec(memory_space=pltpu.MemorySpace.SMEM),  # bias scalar
        ],
        out_specs=pl.BlockSpec((bt, H, W), lambda b: (b, 0, 0)),
        compiler_params=pltpu.CompilerParams(
            dimension_semantics=("parallel",),
            vmem_limit_bytes=vmem_limit),
        cost_estimate=pl.CostEstimate(
            flops=int(flops),
            transcendentals=int(B * H * W),
            bytes_accessed=int(bytes_accessed)),
    )(feat, w, eh, ew, lh, lwt, bias)

    return out.reshape(B, 1, H, W)   # NCHW (B, 1, H, W)


if __name__ == "__main__":
    key = jax.random.PRNGKey(0)
    k_img, k_feat, k_w, k_b = jax.random.split(key, 4)

    B, H, W = 2, 32, 32          # small input image, NCHW like PyTorch
    C, Hf, Wf = 256, 4, 4        # backbone/ASPP feature map (output stride 8)

    image = jax.random.normal(k_img, (B, 3, H, W), jnp.float32)
    features = jax.random.normal(k_feat, (B, C, Hf, Wf), jnp.float32)
    # deterministic init of classifier[4] = Conv2d(256, 1, 1x1)
    conv_w = jax.random.normal(k_w, (1, C, 1, 1), jnp.float32) * 0.05
    conv_b = jax.random.normal(k_b, (1,), jnp.float32) * 0.05

    out = base_module_forward(image, features, conv_w, conv_b)
    out = jax.block_until_ready(out)

    # sanity: shape matches PyTorch module output, values are probabilities
    assert out.shape == (B, 1, H, W), out.shape
    assert bool(jnp.all(jnp.isfinite(out)))
    assert bool(jnp.all((out >= 0.0) & (out <= 1.0)))

    # pure-JAX f32 reference of the translated head (conv1x1 -> bilinear -> sigmoid)
    ref = jnp.einsum("bchw,oc->bohw", features, conv_w.reshape(1, C)) + conv_b[0]
    ref = jax.image.resize(ref, (B, 1, H, W), method="bilinear")
    ref = jax.nn.sigmoid(ref)
    err = float(jnp.max(jnp.abs(out - ref)))
    assert err < 2e-2, err   # bf16 inputs vs f32 reference

    print("KERNEL_OK")
</pallas_src>

<mosaic_0001>
module attributes {stable_mosaic.version = 11 : i64} {
  func.func @_head_kernel(%arg0: i32, %arg1: memref<1x256x16xbf16, #tpu.memory_space<vmem>>, %arg2: memref<1x256xbf16, #tpu.memory_space<vmem>>, %arg3: memref<4x16xbf16, #tpu.memory_space<vmem>>, %arg4: memref<16x4xbf16, #tpu.memory_space<vmem>>, %arg5: memref<32x4xbf16, #tpu.memory_space<vmem>>, %arg6: memref<4x32xbf16, #tpu.memory_space<vmem>>, %arg7: memref<1xf32, #tpu.memory_space<smem>>, %arg8: memref<1x32x32xf32, #tpu.memory_space<vmem>>) attributes {dimension_semantics = [#tpu.dimension_semantics<parallel>], iteration_bounds = array<i64: 2>, scalar_prefetch = 0 : i64, scratch_operands = 0 : i64, tpu.core_type = #tpu.core_type<tc>, window_params = [{transform_indices = @transform_0, window_bounds = array<i64: 1, 256, 16>}, {pipeline_mode = #tpu.pipeline_mode<synchronous>, transform_indices = @transform_1, window_bounds = array<i64: 1, 256>}, {pipeline_mode = #tpu.pipeline_mode<synchronous>, transform_indices = @transform_2, window_bounds = array<i64: 4, 16>}, {pipeline_mode = #tpu.pipeline_mode<synchronous>, transform_indices = @transform_3, window_bounds = array<i64: 16, 4>}, {pipeline_mode = #tpu.pipeline_mode<synchronous>, transform_indices = @transform_4, window_bounds = array<i64: 32, 4>}, {pipeline_mode = #tpu.pipeline_mode<synchronous>, transform_indices = @transform_5, window_bounds = array<i64: 4, 32>}, {transform_indices = @transform_6, window_bounds = array<i64: 1>}, {transform_indices = @transform_7, window_bounds = array<i64: 1, 32, 32>}]} {
    %c0 = arith.constant 0 : index
    %c0_0 = arith.constant 0 : index
    %0 = vector.load %arg2[%c0, %c0_0] : memref<1x256xbf16, #tpu.memory_space<vmem>>, vector<1x256xbf16>
    %c0_1 = arith.constant 0 : index
    %c0_2 = arith.constant 0 : index
    %1 = vector.load %arg3[%c0_1, %c0_2] : memref<4x16xbf16, #tpu.memory_space<vmem>>, vector<4x16xbf16>
    %c0_3 = arith.constant 0 : index
    %c0_4 = arith.constant 0 : index
    %2 = vector.load %arg4[%c0_3, %c0_4] : memref<16x4xbf16, #tpu.memory_space<vmem>>, vector<16x4xbf16>
    %c0_5 = arith.constant 0 : index
    %c0_6 = arith.constant 0 : index
    %3 = vector.load %arg5[%c0_5, %c0_6] : memref<32x4xbf16, #tpu.memory_space<vmem>>, vector<32x4xbf16>
    %c0_7 = arith.constant 0 : index
    %c0_8 = arith.constant 0 : index
    %4 = vector.load %arg6[%c0_7, %c0_8] : memref<4x32xbf16, #tpu.memory_space<vmem>>, vector<4x32xbf16>
    %c0_9 = arith.constant 0 : index
    %5 = memref.load %arg7[%c0_9] : memref<1xf32, #tpu.memory_space<smem>>
    %c0_10 = arith.constant 0 : index
    %c0_11 = arith.constant 0 : index
    %c0_12 = arith.constant 0 : index
    %6 = vector.load %arg1[%c0_10, %c0_11, %c0_12] : memref<1x256x16xbf16, #tpu.memory_space<vmem>>, vector<1x256x16xbf16>
    %7 = vector.shape_cast %6 : vector<1x256x16xbf16> to vector<256x16xbf16>
    %cst = arith.constant dense<0.000000e+00> : vector<1x16xf32>
    %8 = tpu.matmul %0, %7, %cst {dimension_numbers = #tpu.dot_dimension_numbers<[1], [0], [0], [1], [0, 0, 1, 1], [], []>} : vector<1x256xbf16>, vector<256x16xbf16>, vector<1x16xf32> -> vector<1x16xf32>
    %9 = arith.truncf %8 : vector<1x16xf32> to vector<1x16xbf16>
    %10 = vector.broadcast %9 : vector<1x16xbf16> to vector<4x16xbf16>
    %11 = arith.mulf %1, %10 : vector<4x16xbf16>
    %cst_13 = arith.constant dense<0.000000e+00> : vector<4x4xf32>
    %12 = tpu.matmul %11, %2, %cst_13 {dimension_numbers = #tpu.dot_dimension_numbers<[1], [0], [0], [1], [0, 0, 1, 1], [], []>} : vector<4x16xbf16>, vector<16x4xbf16>, vector<4x4xf32> -> vector<4x4xf32>
    %13 = arith.truncf %12 : vector<4x4xf32> to vector<4x4xbf16>
    %cst_14 = arith.constant dense<0.000000e+00> : vector<4x32xf32>
    %14 = tpu.matmul %13, %4, %cst_14 {dimension_numbers = #tpu.dot_dimension_numbers<[1], [0], [0], [1], [0, 0, 1, 1], [], []>} : vector<4x4xbf16>, vector<4x32xbf16>, vector<4x32xf32> -> vector<4x32xf32>
    %15 = arith.truncf %14 : vector<4x32xf32> to vector<4x32xbf16>
    %cst_15 = arith.constant dense<0.000000e+00> : vector<32x32xf32>
    %16 = tpu.matmul %3, %15, %cst_15 {dimension_numbers = #tpu.dot_dimension_numbers<[1], [0], [0], [1], [0, 0, 1, 1], [], []>} : vector<32x4xbf16>, vector<4x32xbf16>, vector<32x32xf32> -> vector<32x32xf32>
    %17 = vector.broadcast %5 : f32 to vector<32x32xf32>
    %18 = arith.addf %16, %17 : vector<32x32xf32>
    %cst_16 = arith.constant 5.000000e-01 : f32
    %19 = vector.broadcast %cst_16 : f32 to vector<32x32xf32>
    %20 = arith.mulf %19, %18 : vector<32x32xf32>
    %21 = math.tanh %20 : vector<32x32xf32>
    %cst_17 = arith.constant 5.000000e-01 : f32
    %22 = vector.broadcast %cst_17 : f32 to vector<32x32xf32>
    %23 = arith.mulf %22, %21 : vector<32x32xf32>
    %cst_18 = arith.constant 5.000000e-01 : f32
    %24 = vector.broadcast %cst_18 : f32 to vector<32x32xf32>
    %25 = arith.addf %23, %24 : vector<32x32xf32>
    %c0_19 = arith.constant 0 : index
    %c0_20 = arith.constant 0 : index
    %c0_21 = arith.constant 0 : index
    %26 = vector.load %arg8[%c0_19, %c0_20, %c0_21] : memref<1x32x32xf32, #tpu.memory_space<vmem>>, vector<1x32x32xf32>
    %27 = vector.shape_cast %26 : vector<1x32x32xf32> to vector<32x32xf32>
    %28 = vector.shape_cast %25 : vector<32x32xf32> to vector<1x32x32xf32>
    tpu.vector_store %arg8[%c0_19, %c0_20, %c0_21], %28 {strides = array<i32>} : memref<1x32x32xf32, #tpu.memory_space<vmem>>, vector<1x32x32xf32>,
    return
  }
  func.func @transform_0(%arg0: i32) -> (i32, i32, i32) {
    %c0_i32 = arith.constant 0 : i32
    %c0_i32_0 = arith.constant 0 : i32
    %c0_i32_1 = arith.constant 0 : i32
    return %arg0, %c0_i32, %c0_i32_0 : i32, i32, i32
  }
  func.func @transform_1(%arg0: i32) -> (i32, i32) {
    %c0_i32 = arith.constant 0 : i32
    %c0_i32_0 = arith.constant 0 : i32
    %c0_i32_1 = arith.constant 0 : i32
    return %c0_i32, %c0_i32_0 : i32, i32
  }
  func.func @transform_2(%arg0: i32) -> (i32, i32) {
    %c0_i32 = arith.constant 0 : i32
    %c0_i32_0 = arith.constant 0 : i32
    %c0_i32_1 = arith.constant 0 : i32
    return %c0_i32, %c0_i32_0 : i32, i32
  }
  func.func @transform_3(%arg0: i32) -> (i32, i32) {
    %c0_i32 = arith.constant 0 : i32
    %c0_i32_0 = arith.constant 0 : i32
    %c0_i32_1 = arith.constant 0 : i32
    return %c0_i32, %c0_i32_0 : i32, i32
  }
  func.func @transform_4(%arg0: i32) -> (i32, i32) {
    %c0_i32 = arith.constant 0 : i32
    %c0_i32_0 = arith.constant 0 : i32
    %c0_i32_1 = arith.constant 0 : i32
    return %c0_i32, %c0_i32_0 : i32, i32
  }
  func.func @transform_5(%arg0: i32) -> (i32, i32) {
    %c0_i32 = arith.constant 0 : i32
    %c0_i32_0 = arith.constant 0 : i32
    %c0_i32_1 = arith.constant 0 : i32
    return %c0_i32, %c0_i32_0 : i32, i32
  }
  func.func @transform_6(%arg0: i32) -> i32 {
    %c0_i32 = arith.constant 0 : i32
    %c0_i32_0 = arith.constant 0 : i32
    return %c0_i32 : i32
  }
  func.func @transform_7(%arg0: i32) -> (i32, i32, i32) {
    %c0_i32 = arith.constant 0 : i32
    %c0_i32_0 = arith.constant 0 : i32
    %c0_i32_1 = arith.constant 0 : i32
    return %arg0, %c0_i32, %c0_i32_0 : i32, i32, i32
  }
}

</mosaic_0001>

<bundles_post_ra>
// kernel: tpu_custom_call.1
= control target key start
LH: loop header
LB: loop body
LE: loop exit
PB: predicated region body
PF: predicated region fallthrough
CT: control target
= control target key end

     0   :  { %s1173_s0 = inlined_call_operand.vmem [shape: bf16[2,256,16], index: 0, kind: input, shape index: {}]   ;;  %s1174_s1 = inlined_call_operand.vmem [shape: bf16[1,256], index: 1, kind: input, shape index: {}]   ;;  %s1175_s2 = inlined_call_operand.vmem [shape: bf16[4,16], index: 2, kind: input, shape index: {}]   ;;  %s1176_s3 = inlined_call_operand.vmem [shape: bf16[16,4], index: 3, kind: input, shape index: {}]   ;;  %s1177_s4 = inlined_call_operand.vmem [shape: bf16[32,4], index: 4, kind: input, shape index: {}]   ;;  %s1178_s5 = inlined_call_operand.vmem [shape: bf16[4,32], index: 5, kind: input, shape index: {}]   ;;  %s1179_s6 = inlined_call_operand.<no memory space> [shape: f32[1], index: 6, kind: input, shape index: {}]   ;;  %s1180_s7 = inlined_call_operand.hbm [shape: f32[2,32,32], index: 7, kind: output, shape index: {}]  }
   0x1   :  { %12 = sst [smem:[#allocation2]] %s1179_s6 }
   0x2   :  { %13 = vsyncpa [#allocation4], 0 }
   0x3   :  { %15 = vsyncpa [#allocation4 + $0x1], 0  ;;  %s1025_s26 = smov 0   ;;  %s1027_s27 = smov 0  }
   0x4   :  { %s1029_s28 = smov 0   ;;  %s1031_s29 = smov 0  }
   0x5 LB: > { %s1046_s6 = sadd.s32 4294967295, %s974_s29   ;;  %s757_s30 = sadd.s32 4294967294, %s974_s29   ;;  %s974_s29 = sphi %s1031_s29, %s1186_s29   ;;  %s970_s28 = sphi %s1029_s28, %s1185_s28   ;;  %s966_s27 = sphi %s1027_s27, %s1184_s27   ;;  %s962_s26 = sphi %s1025_s26, %s1183_s26  }
   0x6   : > { %s1050_s8 = sadd.s32 1, %s974_s29   ;;  %s180_s9 = sadd.s32 1, %s970_s28 }
   0x7   : > { %s177_s10 = ssub.s32 %s974_s29, %s1050_s8  ;;  %p190_p0 = scmp.ne.s32.totalorder %s970_s28, %s966_s27 }
   0x8   : > { %p178_p1 = scmp.eq.s32.totalorder %s177_s10, 0  ;;  %p191_p2 = scmp.eq.s32.totalorder %s1046_s6, 1 }
   0x9   : > { %p196_p3 = scmp.ne.s32.totalorder %s966_s27, %s962_s26  ;;  %p197_p4 = scmp.eq.s32.totalorder %s757_s30, 1 }
   0xa   : > { %s1061_s11 = scalar_select %p178_p1, %s970_s28, %s180_s9  }
   0xb   : > { %p1063_p5 = por %p191_p2, %p190_p0  ;;  %p1067_p6 = por %p197_p4, %p196_p3 }
   0xc   : > { %p760_p7 = scmp.ge.s32.totalorder %s974_s29, 1  ;;  %p241_p8 = scmp.lt.s32.totalorder %s974_s29, 3 }
   0xe   : > { %p242_p9 = pnand %p760_p7, %p241_p8 }
   0xf   : > { %p273_p10 = scmp.lt.s32.totalorder (!%p242_p9), %s1046_s6, 1  ;;  %s979_s30 = smov (!%p242_p9), [#allocation3]  }
  0x10   : > { %245 = sbr.rel (%p242_p9) target bundleno = 892 (0x37c), region = 48  ;;  %s918_s9 = sshll.u32 (!%p242_p9), %s979_s30, 4  ;;  %s919_s9 = int_to_ptr.vmem [resolvable:$false] %s918_s9 }
  0x11   : > { %s920_s10 = scalar_lea.vmem (!%p242_p9), %s919_s9, 1024 }
  0x15   : > { %v764_v0 = vld.sshfl [vmem:[%s1174_s1] sm:$0x11 pattern:$0x75316420]  ;;  %v333_v1 = vlaneseq  ;;  %s274_s16 = scalar_select %p273_p10, %s1046_s6, 1  ;;  %v977_v27 = vmov 0.0  }
  0x16   : > { %v976_v2 = vmov 1966171168   ;;  %v329_v5 = vcombine.high %v764_v0, %v764_v0  ;;  %v903_v26 = vld [vmem:[%s1176_s3] sm:$0xff]   ;;  %824 = vmatprep.subr.bf16.mxu1 %v977_v27  ;;  %vm978_vm0 = vmmov 0   ;;  %vm497_vm1 = vcmask 130048   ;;  %v905_v51 = vld [vmem:[%s1177_s4 + $0x8] sm:$0xff]  }
  0x17   : > { %v331_v3 = vunpack.c.l.s4 %v976_v2  ;;  %v334_v4 = vshrl.u32 %v333_v1, 7  ;;  %s793_s17 = sshll.u32 %s274_s16, 7  ;;  %825 = vmatpush3.bf16.msra.mxu1 %v903_v26  ;;  %826 = vmatprep.mubr.msk.bf16.mxu1 %vm978_vm0, %v977_v27  ;;  %v280_v36 = vld [vmem:[%s1175_s2] sm:$0x3]  ;;  %vm546_vm2 = vcmask 1041408   ;;  %vm542_vm3 = vcmask 31744  }
  0x18   : > { %s1081_s20 = scalar_lea.vmem %s1173_s0, %s793_s17  ;;  %830 = vmatprep.subr.bf16.mxu1 %v977_v27  ;;  %v287_v39 = vld [vmem:[%s1178_s5] sm:$0x3]  ;;  %s288_s16 = sld [smem:[#allocation2]]  ;;  %vm676_vm4 = vcmask 261120  }
  0x19   : > { %v332_v6 = vunpack.c.0.s8 %v331_v3  ;;  %v887_v7 = vld [vmem:[%s1081_s20 + $0x78] sm:$0xff]   ;;  %v889_v10 = vld [vmem:[%s1081_s20 + $0x70] sm:$0xff]   ;;  %v891_v13 = vld [vmem:[%s1081_s20 + $0x68] sm:$0xff]   ;;  %v488_v33 = vsub.s32 0, %v334_v4  ;;  %v548_v40 = vsel %vm546_vm2, %v287_v39, 0  ;;  %s270_s17 = sand.u32 1, %s966_s27  }
  0x1a   : > { %v888_v9 = vld [vmem:[%s1081_s20 + $0x38] sm:$0xff]   ;;  %795 = vmatprep.subr.bf16.mxu0 %v887_v7  ;;  %v890_v12 = vld [vmem:[%s1081_s20 + $0x30] sm:$0xff]   ;;  %v892_v14 = vld [vmem:[%s1081_s20 + $0x28] sm:$0xff]   ;;  %s761_s18 = sshll.u32 %s270_s17, 5 }
  0x1b   : > { %v335_v8 = vsub.s32 %v332_v6, %v334_v4  ;;  %796 = vmatpush3.bf16.msra.mxu0 %v888_v9  ;;  %v893_v15 = vld [vmem:[%s1081_s20 + $0x60] sm:$0xff]   ;;  %v895_v17 = vld [vmem:[%s1081_s20 + $0x58] sm:$0xff]   ;;  %v897_v19 = vld [vmem:[%s1081_s20 + $0x50] sm:$0xff]   ;;  %s272_s19 = scalar_lea.vmem [#allocation3], %s761_s18 }
  0x1c   : > { %797 = vmatprep.subr.bf16.mxu0 %v889_v10  ;;  %v894_v16 = vld [vmem:[%s1081_s20 + $0x20] sm:$0xff]   ;;  %v896_v18 = vld [vmem:[%s1081_s20 + $0x18] sm:$0xff]   ;;  %v898_v20 = vld [vmem:[%s1081_s20 + $0x10] sm:$0xff]   ;;  %s695_s21 = sshll.u32 %s272_s19, 4  ;;  %s1129_s21 = int_to_ptr.vmem [resolvable:$true] %s695_s21 }
  0x1d   : > { %v343_v11 = vrot.slane %v329_v5, %v335_v8  ;;  %v899_v21 = vld [vmem:[%s1081_s20 + $0x48] sm:$0xff]   ;;  %v901_v23 = vld [vmem:[%s1081_s20 + $0x40] sm:$0xff]   ;;  %v336_v25 = vrot.slane %v764_v0, %v335_v8  ;;  %s914_s25 = scalar_lea.vmem %s1129_s21, 512  ;;  %p921_p0 = scmp.lt.s32.totalorder %s1129_s21, %s919_s9 }
  0x1e   : > { %v900_v22 = vld [vmem:[%s1081_s20 + $0x8] sm:$0xff]   ;;  %v902_v24 = vld [vmem:[%s1081_s20] sm:$0xff]   ;;  %v591_v54 = vstv %s288_s16  ;;  %s794_s20 = sshll.u32 %s1046_s6, 9  ;;  %s1133_s6 = scalar_lea.sflag [#allocation4], %s270_s17 }
  0x1f   : > { %474 = vmatprep.mubr.bf16.mxu0 %v343_v11  ;;  %798 = vmatpush3.bf16.msra.mxu0 %v890_v12  ;;  %v904_v46 = vld [vmem:[%s1177_s4] sm:$0xff]   ;;  %s1127_s24 = scalar_lea.hbm %s1180_s7, %s794_s20  ;;  %p915_p11 = scmp.ne.s32.totalorder %s1129_s21, %s914_s25 }
  0x20   : > { %799 = vmatprep.subr.bf16.mxu0 %v891_v13  ;;  %p922_p1 = scmp.lt.s32.totalorder %s920_s10, %s914_s25 }
  0x21   : > { %p916_p12 = pnand %p915_p11, %p1063_p5 }
  0x22   : > { %p923_p2 = por %p922_p1, %p921_p0 }
  0x23   : > { %800 = vmatpush3.bf16.msra.mxu0 %v892_v14  ;;  %p917_p13 = pneg %p916_p12 }
  0x24   : > { %801 = vmatprep.subr.bf16.mxu0 %v893_v15 }
  0x25   : > { %p924_p3 = pnand %p923_p2, %p917_p13 }
  0x27   : > { %802 = vmatpush3.bf16.msra.mxu0 %v894_v16 }
  0x28   : > { %803 = vmatprep.subr.bf16.mxu0 %v895_v17 }
  0x2b   : > { %804 = vmatpush3.bf16.msra.mxu0 %v896_v18 }
  0x2c   : > { %805 = vmatprep.subr.bf16.mxu0 %v897_v19 }
  0x2f   : > { %806 = vmatpush3.bf16.msra.mxu0 %v898_v20 }
  0x30   : > { %807 = vmatprep.subr.bf16.mxu0 %v899_v21 }
  0x33   : > { %808 = vmatpush3.bf16.msra.mxu0 %v900_v22 }
  0x34   : > { %809 = vmatprep.subr.bf16.mxu0 %v901_v23 }
  0x37   : > { %810 = vmatpush3.bf16.msra.mxu0 %v902_v24 }
  0x3a   : > { %475 = vmatmul.mubr.bf16.vlgmr.msra.gmra.mxu0 %v336_v25 }
  0xfa   : > { %v811_v28 = vpop.f32.mrf.mxu0 }
  0xfc   : > { %v812_v29 = vpop.f32.mrf.mxu0 }
  0xfd   : > { %v813_v30 = vadd.f32 %v812_v29, %v811_v28 }
  0xfe   : > { %v814_v31 = vpop.f32.mrf.mxu0 }
  0xff   : > { %v482_v32 = vpack.c.bf16 %v813_v30, %v813_v30 }
 0x100   : > { %v815_v34 = vpop.f32.mrf.mxu0 }
 0x101   : > { %v484_v35 = vpack.i.b16 %v482_v32, %v482_v32 }
 0x103   : > { %v489_v37 = vrot.slane %v484_v35, %v488_v33 }
 0x105   : > { %v490_v38 = vmul.bf16 %v489_v37, %v280_v36 }
 0x107   : > { %827 = vmatmul.mubr.msk.bf16.vlgmr.msra.gmra.mxu1 %vm497_vm1, %v490_v38 }
 0x108   : > { %832 = vmatprep.mubr.msk.bf16.mxu1 %vm978_vm0, %v977_v27  ;;  %831 = vmatpush3.bf16.msra.mxu1 %v548_v40 }
 0x1c7   : > { %v535_v41 = vpop.f32.mrf.mxu1 }
 0x1c8   : > { %v541_v42 = vpack.c.bf16 %v535_v41, %v535_v41 }
 0x1c9   : > { %v828_v43 = vpop.f32.mrf.mxu1 }
 0x1ca   : > { %833 = vmatmul.mubr.msk.bf16.vlgmr.msra.gmra.mxu1 %vm542_vm3, %v541_v42 }
 0x1cb   : > { %v538_v44 = vpop.f32.mrf.mxu1  ;;  %838 = vmatprep.mubr.msk.bf16.mxu1 %vm542_vm3, %v904_v46 }
 0x1cd   : > { %v829_v45 = vpop.f32.mrf.mxu1 }
 0x28a   : > { %v584_v47 = vpop.f32.mrf.mxu1 }
 0x28b   : > { %v590_v48 = vpack.c.bf16 %v584_v47, %v584_v47 }
 0x28c   : > { %v834_v49 = vpop.f32.mrf.mxu1 }
 0x28d   : > { %v609_v50 = vsel %vm546_vm2, %v590_v48, 0  ;;  %842 = vmatprep.subr.msk.bf16.mxu1 %vm546_vm2, %v590_v48 }
 0x28e   : > { %v587_v52 = vpop.f32.mrf.mxu1  ;;  %837 = vmatpush3.bf16.msra.mxu1 %v609_v50 }
 0x290   : > { %v835_v53 = vpop.f32.mrf.mxu1 }
 0x291   : > { %839 = vmatmul.mubr.msk.bf16.vlgmr.msra.gmra.mxu1 %vm542_vm3, %v905_v51 }
 0x351   : > { %v840_v55 = vpop.f32.mrf.mxu1 }
 0x352   : > { %v654_v56 = vadd.f32 %v840_v55, %v591_v54 }
 0x353   : > { %v645_v57 = vpop.f32.mrf.mxu1 }
 0x354   : > { %v662_v58 = vmul.f32 0.5, %v654_v56  ;;  %v646_v59 = vadd.f32 %v645_v57, %v591_v54 }
 0x355   : > { %v841_v60 = vpop.f32.mrf.mxu1 }
 0x356   : > { %906 = vtanh.f32 %v662_v58  ;;  %v660_v61 = vmul.f32 0.5, %v646_v59  ;;  %v657_v62 = vadd.f32 %v841_v60, %v591_v54 }
 0x357   : > { %v648_v63 = vpop.f32.mrf.mxu1 }
 0x358   : > { %908 = vtanh.f32 %v660_v61  ;;  %v663_v0 = vmul.f32 0.5, %v657_v62  ;;  %v649_v1 = vadd.f32 %v648_v63, %v591_v54 }
 0x35a   : > { %910 = vtanh.f32 %v663_v0  ;;  %v661_v2 = vmul.f32 0.5, %v649_v1 }
 0x35c   : > { %912 = vtanh.f32 %v661_v2 }
 0x363   : > { %v907_v3 = vpop.eup %906 }
 0x364   : > { %v670_v4 = vmul.f32 0.5, %v907_v3 }
 0x365   : > { %v909_v5 = vpop.eup %908 }
 0x366   : > { %v674_v6 = vadd.f32 0.5, %v670_v4  ;;  %v668_v7 = vmul.f32 0.5, %v909_v5 }
 0x367   : > { %v911_v8 = vpop.eup %910 }
 0x368   : > { %679 = vst.msk [vmem:[%s272_s19 + $0x10] sm:$0xff] %vm676_vm4, %v674_v6  ;;  %v672_v9 = vadd.f32 0.5, %v668_v7  ;;  %v671_v10 = vmul.f32 0.5, %v911_v8 }
 0x369   : > { %v913_v11 = vpop.eup %912 }
 0x36a   : > { %677 = vst.msk [vmem:[%s272_s19] sm:$0xff] %vm676_vm4, %v672_v9  ;;  %v675_v12 = vadd.f32 0.5, %v671_v10  ;;  %v669_v13 = vmul.f32 0.5, %v913_v11 }
 0x36c   : > { %680 = vst.msk [vmem:[%s272_s19 + $0x18] sm:$0xff] %vm676_vm4, %v675_v12  ;;  %v673_v14 = vadd.f32 0.5, %v669_v13 }
 0x36e   : > { %678 = vst.msk [vmem:[%s272_s19 + $0x8] sm:$0xff] %vm676_vm4, %v673_v14 }
 0x36f   : > { %927 = shalt.err (!%p924_p3)
}
 0x370   : > { %s928_s14 = scalar_lea.hbm %s1127_s24, 512  ;;  %s932_s17 = scalar_lea.hbm %s1180_s7, 1024 }
 0x371   : > { %p929_p4 = scmp.ne.s32.totalorder %s1127_s24, %s928_s14  ;;  %p933_p9 = scmp.lt.s32.totalorder %s1127_s24, %s1180_s7 }
 0x372   : > { %p934_p10 = scmp.lt.s32.totalorder %s932_s17, %s928_s14 }
 0x373   : > { %p930_p7 = pnand %p929_p4, %p1063_p5 }
 0x374   : > { %p935_p11 = por %p934_p10, %p933_p9 }
 0x375   : > { %p931_p8 = pneg %p930_p7 }
 0x377   : > { %p936_p12 = pnand %p935_p11, %p931_p8 }
 0x379   : > { %939 = shalt.err (!%p936_p12)
}
 0x37a   : > { %s980_s20 = smov 128   ;;  %s981_s22 = smov 8  }
 0x37b   : > { %843 = dma.vmem_to_hbm [thread:$0]  (%p1063_p5), %s1129_s21, 512, %s1127_s24, %s1133_s6, %s980_s20, %s980_s20, %s981_s22  }
 0x37c PF: > { %p849_p13 = scmp.ge.s32.totalorder %s974_s29, 2  ;;  %s710_s23 = sand.u32 1, %s962_s26  }
 0x37d   : > { %s711_s25 = scalar_lea.sflag [#allocation4], %s710_s23 }
 0x37e   : > { %p846_p0 = pnand %p849_p13, %p1067_p6 }
 0x380   : > { %p847_p1 = pneg %p846_p0 }
 0x382   : > { %957 = dma.done.wait (%p847_p1), %s711_s25, 512  }
 0x383   : > { %959 = vsyncadd (%p847_p1), %s711_s25, 4294966784  ;;  %p18_p2 = scmp.ge.s32.totalorder %s1050_s8, 4   ;;  %s1183_s26 = smov %s966_s27 }
 0x384   : > { %s1184_s27 = smov %s970_s28  ;;  %s1185_s28 = smov %s1061_s11 }
 0x385   : > { %s1186_s29 = smov %s1050_s8  ;;  %20 = sbr.rel (!%p18_p2) target bundleno = 5 (0x5), region = 83 }
 0x38a   :  { %716 = vsyncpa [#allocation4], 1 }
 0x38b   :  { %718 = vsyncpa [#allocation4 + $0x1], 1 }

</bundles_post_ra>
